<compile_context>
chip_gen: v6e
topology: v6e:2x2x1
jax: 0.10.0
libtpu: 0.0.40
codegen_flags: <defaults>
</compile_context>

<pallas_src>
import math

import jax
import jax.numpy as jnp
from jax import lax
from jax.experimental import pallas as pl
from jax.experimental.pallas import tpu as pltpu


# ----------------------------------------------------------------------------
# Kernels
# ----------------------------------------------------------------------------
def _softmax_pv(s, v, x_ref, attn_ref):
    """Row softmax of s (HB, TQ, Lk) in f32, write attn, then attn @ v."""
    s_max = jnp.max(s, axis=-1, keepdims=True)
    p = jnp.exp(s - s_max)
    denom = jnp.sum(p, axis=-1, keepdims=True)
    # Per-row reciprocal (only HB*TQ elements) + broadcast multiply replaces the
    # HB*TQ*Lk element-wise divide.  approx=False keeps full precision; the
    # reciprocal itself is negligible work either way.
    inv = pl.reciprocal(denom, approx=False)
    attn = p * inv
    attn_ref[0] = attn.astype(attn_ref.dtype)
    x = lax.dot_general(
        attn.astype(v.dtype), v,
        dimension_numbers=(((2,), (1,)), ((0,), (0,))),   # contract Lk, batch HB
        preferred_element_type=jnp.float32)
    x_ref[0] = x.astype(x_ref.dtype)


def _sdpa_kernel(scale_ref, q_ref, k_ref, v_ref, x_ref, attn_ref):
    scale = scale_ref[0]
    q = q_ref[0]                         # (HB, TQ, Dh)
    k = k_ref[0]                         # (HB, Lk, Dh)
    v = v_ref[0]                         # (HB, Lk, Dh)
    # Contract Dh directly (transposed-RHS handled natively by the MXU).
    s = lax.dot_general(
        q, k,
        dimension_numbers=(((2,), (2,)), ((0,), (0,))),
        preferred_element_type=jnp.float32) * scale       # (HB, TQ, Lk) f32
    _softmax_pv(s, v, x_ref, attn_ref)


def _sdpa_kernel_masked(scale_ref, mask_ref, q_ref, k_ref, v_ref, x_ref, attn_ref):
    scale = scale_ref[0]
    q = q_ref[0]                         # (HB, TQ, Dh)
    k = k_ref[0]                         # (HB, Lk, Dh)
    v = v_ref[0]                         # (HB, Lk, Dh)
    s = lax.dot_general(
        q, k,
        dimension_numbers=(((2,), (2,)), ((0,), (0,))),
        preferred_element_type=jnp.float32) * scale       # (HB, TQ, Lk) f32
    m = mask_ref[0]                      # (TQ, Lk), broadcast over the head block
    s = jnp.where(m[None, :, :] == 0, jnp.float32(-1000000000.0), s)
    _softmax_pv(s, v, x_ref, attn_ref)


# ----------------------------------------------------------------------------
# Tile selection
# ----------------------------------------------------------------------------
# Per-step live block-byte budget.  With 2-deep pipelining this stays well
# inside v7x's 64 MiB VMEM (and v5e/v6e's default scoped limit) while leaving
# headroom for compiler scratch.
_VMEM_STEP_BUDGET = 16 * 1024 * 1024


def _choose_tiles(H, Lq, Lk, Dh, in_itemsize, attn_itemsize):
    """Pick (head block HB, query tile TQ).

    Prefers folding heads / large query tiles so each grid step does enough
    work to amortize the ~0.35us step overhead, but never exceeds the VMEM
    budget (the f32 score/attn tile is the dominant term at long Lk).
    """
    def live_bytes(hb, tq):
        qb = hb * tq * Dh * in_itemsize
        kb = hb * Lk * Dh * in_itemsize
        vb = hb * Lk * Dh * in_itemsize
        xb = hb * tq * Dh * in_itemsize
        ab = hb * tq * Lk * attn_itemsize        # attn output block
        sc = hb * tq * Lk * 4                    # f32 scores / softmax intermediate
        # 2x for double-buffered pipeline inputs/outputs, plus the intermediate.
        return 2 * (qb + kb + vb + xb + ab) + sc

    hb_cands = [h for h in (H, 16, 8, 4, 2, 1) if h <= H and H % h == 0]
    tq_cands = [t for t in (Lq, 1024, 512, 256, 128, 64, 32, 16, 8)
                if t <= Lq and Lq % t == 0]      # all are full-Lq or multiples of 8

    best = None
    for hb in hb_cands:
        fit = None
        for tq in tq_cands:                      # descending
            if live_bytes(hb, tq) <= _VMEM_STEP_BUDGET:
                fit = tq
                break
        if fit is None:
            continue
        best = (hb, fit)
        if fit >= min(Lq, 128):                  # big enough q tile -> done
            return best
    return best if best is not None else (1, min(Lq, 128))


# ----------------------------------------------------------------------------
# Wrapper
# ----------------------------------------------------------------------------
def scaled_dot_product_attention(q, k, v, scale, mask=None, attn_drop=0.0):
    """Pallas wrapper. Returns (x, attn) exactly like the PyTorch module."""
    del attn_drop  # eval-mode dropout == identity (attn_drop=0.0)
    B, H, Lq, Dh = q.shape
    Lk = k.shape[2]

    attn_dtype = q.dtype  # softmax stays in the input dtype (matches PyTorch)
    HB, TQ = _choose_tiles(H, Lq, Lk, Dh,
                           jnp.dtype(q.dtype).itemsize,
                           jnp.dtype(attn_dtype).itemsize)

    # Head axis innermost so the mask block (constant over heads) is reused
    # without re-DMA; all axes independent -> "parallel" (megacore-friendly).
    grid = (B, pl.cdiv(Lq, TQ), H // HB)

    scale_arr = jnp.asarray([scale], dtype=jnp.float32)
    scale_spec = pl.BlockSpec(memory_space=pltpu.MemorySpace.SMEM)

    q_spec = pl.BlockSpec((1, HB, TQ, Dh), lambda b, qi, h: (b, h, qi, 0))
    k_spec = pl.BlockSpec((1, HB, Lk, Dh), lambda b, qi, h: (b, h, 0, 0))
    v_spec = pl.BlockSpec((1, HB, Lk, Dh), lambda b, qi, h: (b, h, 0, 0))
    x_spec = pl.BlockSpec((1, HB, TQ, Dh), lambda b, qi, h: (b, h, qi, 0))
    a_spec = pl.BlockSpec((1, HB, TQ, Lk), lambda b, qi, h: (b, h, qi, 0))

    out_shape = (
        jax.ShapeDtypeStruct((B, H, Lq, Dh), q.dtype),     # x
        jax.ShapeDtypeStruct((B, H, Lq, Lk), attn_dtype),  # attn
    )

    if mask is not None:
        m_spec = pl.BlockSpec((1, TQ, Lk), lambda b, qi, h: (b, qi, 0))
        kernel = _sdpa_kernel_masked
        in_specs = [scale_spec, m_spec, q_spec, k_spec, v_spec]
        args = (scale_arr, mask, q, k, v)
    else:
        kernel = _sdpa_kernel
        in_specs = [scale_spec, q_spec, k_spec, v_spec]
        args = (scale_arr, q, k, v)

    return pl.pallas_call(
        kernel,
        out_shape=out_shape,
        grid=grid,
        in_specs=in_specs,
        out_specs=(x_spec, a_spec),
        compiler_params=pltpu.CompilerParams(
            dimension_semantics=("parallel", "parallel", "parallel"),
            vmem_limit_bytes=48 * 1024 * 1024),
    )(*args)


# ----------------------------------------------------------------------------
# Reference + test
# ----------------------------------------------------------------------------
def _reference(q, k, v, scale, mask=None):
    s = jnp.einsum("bhqd,bhkd->bhqk", q, k).astype(jnp.float32) * scale
    if mask is not None:
        s = jnp.where(mask[:, None, :, :] == 0, -1000000000.0, s)
    attn = jax.nn.softmax(s, axis=-1)
    x = jnp.einsum("bhqk,bhkd->bhqd", attn.astype(v.dtype), v)
    return x.astype(q.dtype), attn.astype(q.dtype)


if __name__ == "__main__":
    B, H, Lq, Lk, Dh = 2, 2, 8, 16, 32
    scale = 1.0 / math.sqrt(Dh)

    key = jax.random.PRNGKey(0)
    kq, kk, kv, km = jax.random.split(key, 4)
    q = jax.random.normal(kq, (B, H, Lq, Dh), dtype=jnp.float32)
    k = jax.random.normal(kk, (B, H, Lk, Dh), dtype=jnp.float32)
    v = jax.random.normal(kv, (B, H, Lk, Dh), dtype=jnp.float32)
    # key-padding-style mask: sequence 0 keeps 12 keys, sequence 1 keeps all 16
    lengths = jnp.array([12, 16], dtype=jnp.int32)
    mask = (jnp.arange(Lk)[None, None, :] < lengths[:, None, None]).astype(jnp.int32)
    mask = jnp.broadcast_to(mask, (B, Lq, Lk))

    # masked path
    x, attn = scaled_dot_product_attention(q, k, v, scale, mask=mask)
    jax.block_until_ready((x, attn))
    x_ref, attn_ref = _reference(q, k, v, scale, mask=mask)
    assert jnp.allclose(x, x_ref, atol=1e-5, rtol=1e-5)
    assert jnp.allclose(attn, attn_ref, atol=1e-5, rtol=1e-5)

    # unmasked path (mask=None)
    x2, attn2 = scaled_dot_product_attention(q, k, v, scale, mask=None)
    jax.block_until_ready((x2, attn2))
    x2_ref, attn2_ref = _reference(q, k, v, scale, mask=None)
    assert jnp.allclose(x2, x2_ref, atol=1e-5, rtol=1e-5)
    assert jnp.allclose(attn2, attn2_ref, atol=1e-5, rtol=1e-5)

    print("KERNEL_OK")
</pallas_src>

<mosaic_0001>
module attributes {stable_mosaic.version = 11 : i64} {
  func.func @_sdpa_kernel_masked(%arg0: i32, %arg1: i32, %arg2: i32, %arg3: memref<1xf32, #tpu.memory_space<smem>>, %arg4: memref<1x8x16xi32, #tpu.memory_space<vmem>>, %arg5: memref<1x2x8x32xf32, #tpu.memory_space<vmem>>, %arg6: memref<1x2x16x32xf32, #tpu.memory_space<vmem>>, %arg7: memref<1x2x16x32xf32, #tpu.memory_space<vmem>>, %arg8: memref<1x2x8x32xf32, #tpu.memory_space<vmem>>, %arg9: memref<1x2x8x16xf32, #tpu.memory_space<vmem>>) attributes {dimension_semantics = [#tpu.dimension_semantics<parallel>, #tpu.dimension_semantics<parallel>, #tpu.dimension_semantics<parallel>], iteration_bounds = array<i64: 2, 1, 1>, scalar_prefetch = 0 : i64, scratch_operands = 0 : i64, tpu.core_type = #tpu.core_type<tc>, window_params = [{transform_indices = @transform_0, window_bounds = array<i64: 1>}, {transform_indices = @transform_1, window_bounds = array<i64: 1, 8, 16>}, {transform_indices = @transform_2, window_bounds = array<i64: 1, 2, 8, 32>}, {transform_indices = @transform_3, window_bounds = array<i64: 1, 2, 16, 32>}, {transform_indices = @transform_4, window_bounds = array<i64: 1, 2, 16, 32>}, {transform_indices = @transform_5, window_bounds = array<i64: 1, 2, 8, 32>}, {transform_indices = @transform_6, window_bounds = array<i64: 1, 2, 8, 16>}]} {
    %c0 = arith.constant 0 : index
    %0 = memref.load %arg3[%c0] : memref<1xf32, #tpu.memory_space<smem>>
    %c0_0 = arith.constant 0 : index
    %c0_1 = arith.constant 0 : index
    %c0_2 = arith.constant 0 : index
    %c0_3 = arith.constant 0 : index
    %1 = vector.load %arg5[%c0_0, %c0_1, %c0_2, %c0_3] : memref<1x2x8x32xf32, #tpu.memory_space<vmem>>, vector<1x2x8x32xf32>
    %2 = vector.shape_cast %1 : vector<1x2x8x32xf32> to vector<2x8x32xf32>
    %c0_4 = arith.constant 0 : index
    %c0_5 = arith.constant 0 : index
    %c0_6 = arith.constant 0 : index
    %c0_7 = arith.constant 0 : index
    %3 = vector.load %arg6[%c0_4, %c0_5, %c0_6, %c0_7] : memref<1x2x16x32xf32, #tpu.memory_space<vmem>>, vector<1x2x16x32xf32>
    %4 = vector.shape_cast %3 : vector<1x2x16x32xf32> to vector<2x16x32xf32>
    %c0_8 = arith.constant 0 : index
    %c0_9 = arith.constant 0 : index
    %c0_10 = arith.constant 0 : index
    %c0_11 = arith.constant 0 : index
    %5 = vector.load %arg7[%c0_8, %c0_9, %c0_10, %c0_11] : memref<1x2x16x32xf32, #tpu.memory_space<vmem>>, vector<1x2x16x32xf32>
    %6 = vector.shape_cast %5 : vector<1x2x16x32xf32> to vector<2x16x32xf32>
    %cst = arith.constant dense<0.000000e+00> : vector<2x8x16xf32>
    %7 = tpu.matmul %2, %4, %cst {dimension_numbers = #tpu.dot_dimension_numbers<[2], [2], [1], [1], [0, 0, 0, 1, 1, 1], [0], [0]>} : vector<2x8x32xf32>, vector<2x16x32xf32>, vector<2x8x16xf32> -> vector<2x8x16xf32>
    %8 = vector.broadcast %0 : f32 to vector<2x8x16xf32>
    %9 = arith.mulf %7, %8 : vector<2x8x16xf32>
    %c0_12 = arith.constant 0 : index
    %c0_13 = arith.constant 0 : index
    %c0_14 = arith.constant 0 : index
    %10 = vector.load %arg4[%c0_12, %c0_13, %c0_14] : memref<1x8x16xi32, #tpu.memory_space<vmem>>, vector<1x8x16xi32>
    %11 = vector.shape_cast %10 : vector<1x8x16xi32> to vector<8x16xi32>
    %12 = vector.shape_cast %11 : vector<8x16xi32> to vector<1x8x16xi32>
    %c0_i32 = arith.constant 0 : i32
    %13 = vector.broadcast %c0_i32 : i32 to vector<1x8x16xi32>
    %14 = arith.cmpi eq, %12, %13 : vector<1x8x16xi32>
    %cst_15 = arith.constant -1.000000e+09 : f32
    %15 = vector.shape_cast %14 : vector<1x8x16xi1> to vector<1x8x16xi1>
    %16 = vector.broadcast %15 : vector<1x8x16xi1> to vector<2x8x16xi1>
    %17 = vector.broadcast %cst_15 : f32 to vector<2x8x16xf32>
    %18 = arith.select %16, %17, %9 : vector<2x8x16xi1>, vector<2x8x16xf32>
    %cst_16 = arith.constant dense<0xFF800000> : vector<2x8xf32>
    %19 = vector.multi_reduction <maximumf>, %18, %cst_16 [2] : vector<2x8x16xf32> to vector<2x8xf32>
    %20 = vector.shape_cast %19 : vector<2x8xf32> to vector<2x8x1xf32>
    %21 = vector.broadcast %20 : vector<2x8x1xf32> to vector<2x8x16xf32>
    %22 = arith.subf %18, %21 : vector<2x8x16xf32>
    %23 = math.exp %22 : vector<2x8x16xf32>
    %cst_17 = arith.constant dense<0.000000e+00> : vector<2x8xf32>
    %24 = vector.multi_reduction <add>, %23, %cst_17 [2] : vector<2x8x16xf32> to vector<2x8xf32>
    %25 = vector.shape_cast %24 : vector<2x8xf32> to vector<2x8x1xf32>
    %26 = tpu.reciprocal %25 : vector<2x8x1xf32> -> vector<2x8x1xf32>
    %27 = vector.broadcast %26 : vector<2x8x1xf32> to vector<2x8x16xf32>
    %28 = arith.mulf %23, %27 : vector<2x8x16xf32>
    %c0_18 = arith.constant 0 : index
    %c0_19 = arith.constant 0 : index
    %c0_20 = arith.constant 0 : index
    %c0_21 = arith.constant 0 : index
    %29 = vector.load %arg9[%c0_18, %c0_19, %c0_20, %c0_21] : memref<1x2x8x16xf32, #tpu.memory_space<vmem>>, vector<1x2x8x16xf32>
    %30 = vector.shape_cast %29 : vector<1x2x8x16xf32> to vector<2x8x16xf32>
    %31 = vector.shape_cast %28 : vector<2x8x16xf32> to vector<1x2x8x16xf32>
    tpu.vector_store %arg9[%c0_18, %c0_19, %c0_20, %c0_21], %31 {strides = array<i32>} : memref<1x2x8x16xf32, #tpu.memory_space<vmem>>, vector<1x2x8x16xf32>,
    %cst_22 = arith.constant dense<0.000000e+00> : vector<2x8x32xf32>
    %32 = tpu.matmul %28, %6, %cst_22 {dimension_numbers = #tpu.dot_dimension_numbers<[2], [1], [1], [2], [0, 0, 0, 1, 1, 2], [0], [0]>} : vector<2x8x16xf32>, vector<2x16x32xf32>, vector<2x8x32xf32> -> vector<2x8x32xf32>
    %c0_23 = arith.constant 0 : index
    %c0_24 = arith.constant 0 : index
    %c0_25 = arith.constant 0 : index
    %c0_26 = arith.constant 0 : index
    %33 = vector.load %arg8[%c0_23, %c0_24, %c0_25, %c0_26] : memref<1x2x8x32xf32, #tpu.memory_space<vmem>>, vector<1x2x8x32xf32>
    %34 = vector.shape_cast %33 : vector<1x2x8x32xf32> to vector<2x8x32xf32>
    %35 = vector.shape_cast %32 : vector<2x8x32xf32> to vector<1x2x8x32xf32>
    tpu.vector_store %arg8[%c0_23, %c0_24, %c0_25, %c0_26], %35 {strides = array<i32>} : memref<1x2x8x32xf32, #tpu.memory_space<vmem>>, vector<1x2x8x32xf32>,
    return
  }
  func.func @transform_0(%arg0: i32, %arg1: i32, %arg2: i32) -> i32 {
    %c0_i32 = arith.constant 0 : i32
    %c0_i32_0 = arith.constant 0 : i32
    return %c0_i32 : i32
  }
  func.func @transform_1(%arg0: i32, %arg1: i32, %arg2: i32) -> (i32, i32, i32) {
    %c0_i32 = arith.constant 0 : i32
    %c0_i32_0 = arith.constant 0 : i32
    return %arg0, %arg1, %c0_i32 : i32, i32, i32
  }
  func.func @transform_2(%arg0: i32, %arg1: i32, %arg2: i32) -> (i32, i32, i32, i32) {
    %c0_i32 = arith.constant 0 : i32
    %c0_i32_0 = arith.constant 0 : i32
    return %arg0, %arg2, %arg1, %c0_i32 : i32, i32, i32, i32
  }
  func.func @transform_3(%arg0: i32, %arg1: i32, %arg2: i32) -> (i32, i32, i32, i32) {
    %c0_i32 = arith.constant 0 : i32
    %c0_i32_0 = arith.constant 0 : i32
    %c0_i32_1 = arith.constant 0 : i32
    return %arg0, %arg2, %c0_i32, %c0_i32_0 : i32, i32, i32, i32
  }
  func.func @transform_4(%arg0: i32, %arg1: i32, %arg2: i32) -> (i32, i32, i32, i32) {
    %c0_i32 = arith.constant 0 : i32
    %c0_i32_0 = arith.constant 0 : i32
    %c0_i32_1 = arith.constant 0 : i32
    return %arg0, %arg2, %c0_i32, %c0_i32_0 : i32, i32, i32, i32
  }
  func.func @transform_5(%arg0: i32, %arg1: i32, %arg2: i32) -> (i32, i32, i32, i32) {
    %c0_i32 = arith.constant 0 : i32
    %c0_i32_0 = arith.constant 0 : i32
    return %arg0, %arg2, %arg1, %c0_i32 : i32, i32, i32, i32
  }
  func.func @transform_6(%arg0: i32, %arg1: i32, %arg2: i32) -> (i32, i32, i32, i32) {
    %c0_i32 = arith.constant 0 : i32
    %c0_i32_0 = arith.constant 0 : i32
    return %arg0, %arg2, %arg1, %c0_i32 : i32, i32, i32, i32
  }
}

</mosaic_0001>

<bundles_post_ra>
// kernel: tpu_custom_call.1
= control target key start
LH: loop header
LB: loop body
LE: loop exit
PB: predicated region body
PF: predicated region fallthrough
CT: control target
= control target key end

     0   :  { %s1807_s0 = inlined_call_operand.<no memory space> [shape: f32[1], index: 0, kind: input, shape index: {}]   ;;  %s1808_s1 = inlined_call_operand.hbm [shape: s32[2,8,16], index: 1, kind: input, shape index: {}]   ;;  %s1809_s2 = inlined_call_operand.hbm [shape: f32[2,2,8,32], index: 2, kind: input, shape index: {}]   ;;  %s1810_s3 = inlined_call_operand.hbm [shape: f32[2,2,16,32], index: 3, kind: input, shape index: {}]   ;;  %s1811_s4 = inlined_call_operand.hbm [shape: f32[2,2,16,32], index: 4, kind: input, shape index: {}]   ;;  %s1812_s5 = inlined_call_operand.hbm [shape: f32[2,2,8,32], index: 5, kind: output, shape index: {0}]   ;;  %s1813_s6 = inlined_call_operand.hbm [shape: f32[2,2,8,16], index: 6, kind: output, shape index: {1}]  }
   0x1   :  { %1821 = sst [smem:[#allocation23_spill]] %s1808_s1 }
   0x2   :  { %1822 = sst [smem:[#allocation24_spill]] %s1809_s2 }
   0x3   :  { %1823 = sst [smem:[#allocation25_spill]] %s1810_s3 }
   0x4   :  { %12 = sst [smem:[#allocation2]] %s1807_s0 }
   0x5   :  { %13 = vsyncpa [#allocation4], 0 }
   0x6   :  { %15 = vsyncpa [#allocation4 + $0x1], 0 }
   0x7   :  { %16 = vsyncpa [#allocation7], 0 }
   0x8   :  { %18 = vsyncpa [#allocation7 + $0x1], 0 }
   0x9   :  { %19 = vsyncpa [#allocation10], 0 }
   0xa   :  { %21 = vsyncpa [#allocation10 + $0x1], 0 }
   0xb   :  { %22 = vsyncpa [#allocation5], 0 }
   0xc   :  { %24 = vsyncpa [#allocation5 + $0x1], 0 }
   0xd   :  { %25 = vsyncpa [#allocation13], 0 }
   0xe   :  { %27 = vsyncpa [#allocation13 + $0x1], 0  ;;  %s1503_s23 = smov 0   ;;  %s1505_s24 = smov 0  }
   0xf   :  { %s1507_s25 = smov 0   ;;  %s1509_s26 = smov 0  }
  0x10   :  { %s1511_s27 = smov 0   ;;  %s1513_s0 = smov 0  }
  0x11 LB: > { %1824 = sst [smem:[#allocation19_spill]] %s1439_s25  ;;  %s1534_s28 = sadd.s32 4294967295, %s1451_s0   ;;  %s1451_s0 = sphi %s1513_s0, %s33_s0   ;;  %s1447_s27 = sphi %s1511_s27, %s1846_s27   ;;  %s1443_s26 = sphi %s1509_s26, %s1845_s26   ;;  %s1439_s25 = sphi %s1507_s25, %s1841_s25   ;;  %s1435_s24 = sphi %s1505_s24, %s1844_s24   ;;  %s1431_s23 = sphi %s1503_s23, %s1843_s23  }
  0x12   : > { %s1043_s29 = sadd.s32 4294967294, %s1451_s0   ;;  %s52_s30 = sadd.s32 1, %s1447_s27 }
  0x13   : > { %s82_s7 = sadd.s32 1, %s1439_s25  ;;  %p54_p0 = scmp.ge.s32.totalorder %s52_s30, 2 }
  0x14   : > { %p89_p1 = scmp.ne.s32.totalorder %s1439_s25, %s1435_s24  ;;  %p90_p2 = scmp.eq.s32.totalorder %s1451_s0, 0 }
  0x15   : > { %p95_p3 = scmp.ne.s32.totalorder %s1435_s24, %s1431_s23  ;;  %s1848_s30 = smov (%p54_p0, %s52_s30), 0 }
  0x16   : > { %1825 = sst [smem:[#allocation20_spill]] %s1848_s30  ;;  %p1546_p4 = por %p90_p2, %p89_p1 }
  0x17   : > { %p96_p5 = scmp.eq.s32.totalorder %s1534_s28, 0  ;;  %s77_s9 = ssub.s32 %s1447_s27, %s1848_s30 }
  0x18   : > { %p209_p6 = scmp.eq.s32.totalorder %s1534_s28, 1  ;;  %p80_p7 = scmp.eq.s32.totalorder %s77_s9, 0 }
  0x19   : > { %p1554_p8 = por %p96_p5, %p95_p3  ;;  %p215_p10 = scmp.eq.s32.totalorder %s1043_s29, 1 }
  0x1a   : > { %p1558_p9 = por %p209_p6, %p89_p1  ;;  %p1045_p12 = scmp.ge.s32.totalorder %s1451_s0, 2 }
  0x1b   : > { %s1563_s12 = scalar_select %p80_p7, %s1439_s25, %s82_s7  }
  0x1c   : > { %p1565_p11 = por %p215_p10, %p95_p3  ;;  %p1157_p13 = scmp.lt.s32.totalorder %s1451_s0, 2 }
  0x1d   : > { %1829 = sst [smem:[#allocation21_spill]] %s1563_s12  ;;  %s1572_s14 = sand.u32 1, %s1439_s25  }
  0x1e   : > { %s1830_s13 = scalar_select %p1565_p11, 1, 0 }
  0x1f   : > { %s287_s15 = sand.u32 1, %s1451_s0   ;;  %s1048_s16 = sshll.u32 %s1572_s14, 4 }
  0x20   : > { %1831 = sst [smem:[#allocation22_spill]] %s1830_s13  ;;  %p1578_p0 = pnand %p1157_p13, %p1546_p4 }
  0x21   : > { %s1080_s18 = sshll.u32 %s1447_s27, 8  ;;  %s1833_s2 = sld [smem:[#allocation24_spill]] }
  0x22   : > { %s291_s22 = scalar_lea.vmem [#allocation6], %s1048_s16  ;;  %s1586_s7 = scalar_lea.sflag [#allocation7], %s287_s15 }
  0x23   : > { %s301_s29 = sshll.u32 %s291_s22, 4  ;;  %p1223_p1 = pneg %p1578_p0  ;;  %s302_s29 = int_to_ptr.vmem [resolvable:$true] %s301_s29 }
  0x24   : > { %s1234_s9 = scalar_lea.vmem %s302_s29, 256  ;;  %s1453_s8 = smov [#allocation6]  }
  0x25   : > { %p1235_p2 = scmp.ne.s32.totalorder %s302_s29, %s1234_s9  ;;  %s1239_s30 = sshll.u32 %s1453_s8, 4  ;;  %s1240_s30 = int_to_ptr.vmem [resolvable:$false] %s1239_s30 }
  0x26   : > { %s1241_s12 = scalar_lea.vmem %s1240_s30, 512  ;;  %p1242_p5 = scmp.lt.s32.totalorder %s302_s29, %s1240_s30 }
  0x27   : > { %s300_s21 = scalar_lea.hbm %s1833_s2, %s1080_s18  ;;  %p1237_p3 = pnand %p1235_p2, %p1223_p1 }
  0x28   : > { %p1243_p6 = scmp.lt.s32.totalorder %s1241_s12, %s1234_s9 }
  0x29   : > { %p1238_p4 = pneg %p1237_p3 }
  0x2a   : > { %p1244_p7 = por %p1243_p6, %p1242_p5 }
  0x2c   : > { %p1245_p10 = pnand %p1244_p7, %p1238_p4 }
  0x2e   : > { %1248 = shalt.err (!%p1245_p10)
}
  0x2f   : > { %s1817_s16 = smov 128   ;;  %s1819_s15 = smov 8  }
  0x30   : > { %1143 = dma.hbm_to_vmem [thread:$0]  (!%p1578_p0), %s300_s21, 256, %s302_s29, %s1586_s7, %s1817_s16, %s1817_s16, %s1819_s15  }
  0x31   : > { %p1057_p13 = scmp.ge.s32.totalorder %s1451_s0, 1  ;;  %p357_p2 = scmp.lt.s32.totalorder %s1451_s0, 3 }
  0x32   : > { %s1046_s12 = sshll.u32 %s1572_s14, 3  ;;  %s1047_s18 = sshll.u32 %s1447_s27, 7 }
  0x33   : > { %p1601_p3 = pnand %p1057_p13, %p357_p2  ;;  %s1835_s1 = sld [smem:[#allocation23_spill]] }
  0x34   : > { %s272_s9 = scalar_lea.vmem [#allocation3], %s1046_s12  ;;  %s1051_s2 = sshll.u32 %s1572_s14, 5 }
  0x35   : > { %s280_s8 = sshll.u32 %s272_s9, 4  ;;  %s269_s25 = scalar_lea.sflag [#allocation4], %s1572_s14  ;;  %s281_s8 = int_to_ptr.vmem [resolvable:$true] %s280_s8 }
  0x36   : > { %s1262_s13 = scalar_lea.vmem %s281_s8, 128  ;;  %s1456_s21 = smov [#allocation3]  }
  0x37   : > { %p1263_p4 = scmp.ne.s32.totalorder %s281_s8, %s1262_s13  ;;  %s1267_s29 = sshll.u32 %s1456_s21, 4  ;;  %s1268_s29 = int_to_ptr.vmem [resolvable:$false] %s1267_s29 }
  0x38   : > { %s1269_s16 = scalar_lea.vmem %s1268_s29, 256  ;;  %p1270_p7 = scmp.lt.s32.totalorder %s281_s8, %s1268_s29 }
  0x39   : > { %s278_s22 = scalar_lea.hbm %s1835_s1, %s1047_s18  ;;  %p1265_p5 = pnand %p1263_p4, %p1223_p1 }
  0x3a   : > { %p1271_p10 = scmp.lt.s32.totalorder %s1269_s16, %s1262_s13 }
  0x3b   : > { %p1266_p6 = pneg %p1265_p5 }
  0x3c   : > { %p1272_p13 = por %p1271_p10, %p1270_p7 }
  0x3e   : > { %p1273_p2 = pnand %p1272_p13, %p1266_p6 }
  0x40   : > { %1276 = shalt.err (!%p1273_p2)
}
  0x41   : > { %1140 = dma.hbm_to_vmem [thread:$0]  (!%p1578_p0), %s278_s22, 128, %s281_s8, %s269_s25  }
  0x42   : > { %s1081_s12 = sshll.u32 %s1447_s27, 9  ;;  %s315_s18 = scalar_lea.vmem [#allocation8], %s1051_s2 }
  0x43   : > { %s325_s19 = sshll.u32 %s315_s18, 4  ;;  %s1836_s3 = sld [smem:[#allocation25_spill]]  ;;  %s326_s19 = int_to_ptr.vmem [resolvable:$true] %s325_s19 }
  0x44   : > { %s1290_s29 = scalar_lea.vmem %s326_s19, 512  ;;  %s1457_s13 = smov [#allocation8]  }
  0x45   : > { %p1291_p4 = scmp.ne.s32.totalorder %s326_s19, %s1290_s29  ;;  %s1295_s16 = sshll.u32 %s1457_s13, 4  ;;  %s1296_s16 = int_to_ptr.vmem [resolvable:$false] %s1295_s16 }
  0x46   : > { %s1297_s15 = scalar_lea.vmem %s1296_s16, 1024  ;;  %p1298_p7 = scmp.lt.s32.totalorder %s326_s19, %s1296_s16 }
  0x47   : > { %p1293_p5 = pnand %p1291_p4, %p1223_p1  ;;  %p1299_p10 = scmp.lt.s32.totalorder %s1297_s15, %s1290_s29 }
  0x49   : > { %s324_s21 = scalar_lea.hbm %s1836_s3, %s1081_s12  ;;  %p1294_p6 = pneg %p1293_p5 }
  0x4a   : > { %p1300_p13 = por %p1299_p10, %p1298_p7 }
  0x4c   : > { %p1301_p2 = pnand %p1300_p13, %p1294_p6 }
  0x4e   : > { %1304 = shalt.err (!%p1301_p2)
}
  0x4f   : > { %s1837_s25 = smov 8   ;;  %s1838_s22 = smov 128  }
  0x50   : > { %1146 = dma.hbm_to_vmem [thread:$0]  (!%p1578_p0), %s324_s21, 512, %s326_s19, %s1586_s7, %s1838_s22, %s1838_s22, %s1837_s25  }
  0x51   : > { %s348_s20 = scalar_lea.hbm %s1811_s4, %s1081_s12  ;;  %s339_s9 = scalar_lea.vmem [#allocation9], %s1051_s2 }
  0x52   : > { %s349_s15 = sshll.u32 %s339_s9, 4  ;;  %s336_s29 = scalar_lea.sflag [#allocation10], %s1572_s14  ;;  %s350_s15 = int_to_ptr.vmem [resolvable:$true] %s349_s15 }
  0x53   : > { %s1318_s13 = scalar_lea.vmem %s350_s15, 512  ;;  %s1458_s16 = smov [#allocation9]  }
  0x54   : > { %p1319_p4 = scmp.ne.s32.totalorder %s350_s15, %s1318_s13  ;;  %s1323_s1 = sshll.u32 %s1458_s16, 4  ;;  %s1324_s1 = int_to_ptr.vmem [resolvable:$false] %s1323_s1 }
  0x55   : > { %s1325_s3 = scalar_lea.vmem %s1324_s1, 1024  ;;  %p1326_p7 = scmp.lt.s32.totalorder %s350_s15, %s1324_s1 }
  0x56   : > { %p1321_p5 = pnand %p1319_p4, %p1223_p1  ;;  %p1327_p10 = scmp.lt.s32.totalorder %s1325_s3, %s1318_s13 }
  0x58   : > { %p1322_p6 = pneg %p1321_p5  ;;  %p1328_p13 = por %p1327_p10, %p1326_p7 }
  0x5a   : > { %p1329_p2 = pnand %p1328_p13, %p1322_p6 }
  0x5c   : > { %1332 = shalt.err (!%p1329_p2)
}
  0x5d   : > { %1149 = dma.hbm_to_vmem [thread:$0]  (!%p1578_p0), %s348_s20, 512, %s350_s15, %s336_s29, %s1838_s22, %s1838_s22, %s1837_s25  }
  0x5e   : > { %361 = sbr.rel (%p1601_p3) target bundleno = 835 (0x343), region = 40  ;;  %s1649_s2 = sand.u32 (!%p1601_p3), 1, %s1435_s24  }
  0x5f   : > { %s1058_s1 = sshll.u32 (!%p1601_p3), %s1649_s2, 3  ;;  %s364_s3 = scalar_lea.sflag (!%p1601_p3), [#allocation4], %s1649_s2 }
  0x60   : > { %s1653_s14 = scalar_lea.vmem (!%p1601_p3), [#allocation3], %s1058_s1 }
  0x63   : > { %1410 = dma.done.wait (%p1554_p8), %s364_s3, 128  }
  0x64   : > { %1412 = vsyncadd (%p1554_p8), %s364_s3, 4294967168  ;;  %s372_s17 = sand.u32 1, %s1534_s28   ;;  %s1661_s7 = sshll.u32 %s1649_s2, 4 }
  0x65   : > { %s373_s30 = scalar_lea.sflag [#allocation7], %s372_s17  ;;  %s376_s12 = scalar_lea.vmem [#allocation6], %s1661_s7 }
  0x66   : > { %1414 = dma.done.wait (%p1554_p8), %s373_s30, 768  }
  0x67   : > { %1416 = vsyncadd (%p1554_p8), %s373_s30, 4294966528  ;;  %s1060_s19 = sshll.u32 %s1649_s2, 5  ;;  %s391_s25 = scalar_lea.sflag [#allocation10], %s1649_s2 }
  0x68   : > { %s385_s21 = scalar_lea.vmem [#allocation8], %s1060_s19  ;;  %s1670_s22 = scalar_lea.vmem [#allocation9], %s1060_s19 }
  0x69   : > { %1418 = dma.done.wait (%p1554_p8), %s391_s25, 512  }
  0x6a   : > { %1420 = vsyncadd (%p1554_p8), %s391_s25, 4294966784  ;;  %v1459_v0 = vmov 0.0   ;;  %vm1460_vm0 = vmmov 0   ;;  %vm459_vm1 = vcmask 261120   ;;  %v452_v1 = vld [vmem:[%s385_s21 + $0x8] sm:$0xff]  ;;  %v454_v2 = vld [vmem:[%s385_s21 + $0x18] sm:$0xff] }
  0x6b   : > { %1097 = vmatprep.subr.mxu0 %v1459_v0  ;;  %1104 = vmatprep.subr.mxu1 %v1459_v0  ;;  %v451_v3 = vld [vmem:[%s385_s21] sm:$0xff]  ;;  %v453_v4 = vld [vmem:[%s385_s21 + $0x10] sm:$0xff]  ;;  %v450_v6 = vld [vmem:[%s376_s12 + $0x8] sm:$0xff]  ;;  %s448_s28 = sld [smem:[#allocation2]]  ;;  %vm627_vm3 = vcmask 130048   ;;  %s442_s10 = scalar_lea.vmem [#allocation12], %s1661_s7 }
  0x6c   : > { %1101 = vmatprep.mubr.msk.f32.mxu0 %vm1460_vm0, %v1459_v0  ;;  %1108 = vmatprep.mubr.msk.f32.mxu1 %vm1460_vm0, %v1459_v0  ;;  %v449_v5 = vld [vmem:[%s376_s12] sm:$0xff]  ;;  %v621_v7 = vld [vmem:[%s1653_s14] sm:$0xff]  ;;  %v456_v29 = vld [vmem:[%s1670_s22 + $0x8] sm:$0xff]  ;;  %s1083_s8 = sshll.u32 %s1443_s26, 8  ;;  %s841_s18 = sshll.u32 %s442_s10, 4  ;;  %s1720_s18 = int_to_ptr.vmem [resolvable:$true] %s841_s18 }
  0x6d   : > { %1098 = vmatpush3.xpose.msk.msra.mxu0 %vm459_vm1, %v452_v1  ;;  %1105 = vmatpush3.xpose.msk.msra.mxu1 %vm459_vm1, %v454_v2  ;;  %vm622_vm2 = vcmp.eq.s32.totalorder %v621_v7, 0  ;;  %v455_v30 = vld [vmem:[%s1670_s22] sm:$0xff]  ;;  %v458_v31 = vld [vmem:[%s1670_s22 + $0x18] sm:$0xff]  ;;  %v457_v32 = vld [vmem:[%s1670_s22 + $0x10] sm:$0xff]  ;;  %s1718_s15 = scalar_lea.hbm %s1813_s6, %s1083_s8  ;;  %s806_s29 = scalar_lea.sflag [#allocation13], %s1649_s2 }
  0x6e   : > { %1099 = vmatprep.subr.mxu0 %v1459_v0  ;;  %1106 = vmatprep.subr.mxu1 %v1459_v0  ;;  %s1333_s13 = scalar_lea.vmem %s1720_s18, 256  ;;  %s1461_s16 = smov [#allocation12]  }
  0x6f   : > { %p1334_p8 = scmp.ne.s32.totalorder %s1720_s18, %s1333_s13  ;;  %s1337_s1 = sshll.u32 %s1461_s16, 4  ;;  %s1338_s1 = int_to_ptr.vmem [resolvable:$false] %s1337_s1 }
  0x70   : > { %s1339_s3 = scalar_lea.vmem %s1338_s1, 512  ;;  %p1340_p3 = scmp.lt.s32.totalorder %s1720_s18, %s1338_s1 }
  0x71   : > { %1100 = vmatpush3.xpose.msk.msra.mxu0 %vm459_vm1, %v451_v3  ;;  %1107 = vmatpush3.xpose.msk.msra.mxu1 %vm459_vm1, %v453_v4  ;;  %v618_v8 = vstv %s448_s28  ;;  %p1335_p0 = pnand %p1334_p8, %p1558_p9  ;;  %p1341_p4 = scmp.lt.s32.totalorder %s1339_s3, %s1333_s13 }
  0x72   : > { %1111 = vmatprep.subr.mxu0 %v1459_v0  ;;  %1118 = vmatprep.subr.mxu1 %v1459_v0 }
  0x73   : > { %p1336_p1 = pneg %p1335_p0  ;;  %p1342_p5 = por %p1341_p4, %p1340_p3 }
  0x74   : > { %1102 = vmatmul.mubr.msk.f32.vlgmr.msra.gmra.mxu0 %vm459_vm1, %v449_v5  ;;  %1109 = vmatmul.mubr.msk.f32.vlgmr.msra.gmra.mxu1 %vm459_vm1, %v450_v6 }
  0x75   : > { %1115 = vmatprep.mubr.msk.f32.mxu0 %vm1460_vm0, %v1459_v0  ;;  %1122 = vmatprep.mubr.msk.f32.mxu1 %vm1460_vm0, %v1459_v0  ;;  %p1343_p6 = pnand %p1342_p5, %p1336_p1 }
  0x76   : > { %1112 = vmatpush3.msra.mxu0 %v456_v29  ;;  %1119 = vmatpush3.msra.mxu1 %v458_v31 }
  0x77   : > { %1113 = vmatprep.subr.mxu0 %v1459_v0  ;;  %1120 = vmatprep.subr.mxu1 %v1459_v0 }
  0x78   : > { %1114 = vmatpush3.msra.mxu0 %v455_v30  ;;  %1121 = vmatpush3.msra.mxu1 %v457_v32 }
 0x134   : > { %v535_v9 = vpop.f32.mrf.mxu0  ;;  %v614_v10 = vpop.f32.mrf.mxu1 }
 0x135   : > { %v619_v11 = vmul.f32 %v618_v8, %v535_v9  ;;  %v620_v12 = vmul.f32 %v618_v8, %v614_v10 }
 0x136   : > { %v1103_v13 = vpop.f32.mrf.mxu0  ;;  %v1110_v14 = vpop.f32.mrf.mxu1 }
 0x137   : > { %v625_v15 = vsel %vm622_vm2, -1e+09, %v619_v11  ;;  %v626_v16 = vsel %vm622_vm2, -1e+09, %v620_v12 }
 0x138   : > { %v628_v17 = vsel %vm627_vm3, %v625_v15, -inf  ;;  %v631_v18 = vsel %vm627_vm3, %v626_v16, -inf }
 0x139   : > { %629 = vmax.xlane.f32.xlu0 %v628_v17 }
 0x13d   : > { %632 = vmax.xlane.f32.xlu0 %v631_v18 }
 0x1c2   : > { %v630_v19 = vpop.xlane.xlu0 %629 }
 0x1c3   : > { %v634_v20 = vsub.f32 %v625_v15, %v630_v19 }
 0x1c5   : > { %v636_v21 = vmul.f32 1.442695, %v634_v20 }
 0x1c6   : > { %v633_v22 = vpop.xlane.xlu0 %632 }
 0x1c7   : > { %1213 = vpow2.f32 %v636_v21  ;;  %v635_v23 = vsub.f32 %v626_v16, %v633_v22 }
 0x1c9   : > { %v638_v24 = vmul.f32 1.442695, %v635_v23 }
 0x1cb   : > { %1215 = vpow2.f32 %v638_v24 }
 0x1d4   : > { %v1214_v25 = vpop.eup %1213 }
 0x1d5   : > { %v640_v26 = vsel %vm627_vm3, %v1214_v25, 0.0 }
 0x1d6   : > { %641 = vadd.xlane.f32.xlu1 %v640_v26 }
 0x1d8   : > { %v1216_v27 = vpop.eup %1215 }
 0x1d9   : > { %v643_v28 = vsel %vm627_vm3, %v1216_v27, 0.0 }
 0x1da   : > { %644 = vadd.xlane.f32.xlu1 %v643_v28 }
 0x25f   : > { %v642_v33 = vpop.xlane.xlu1 %641 }
 0x260   : > { %1217 = vrcp.f32 %v642_v33 }
 0x263   : > { %v645_v34 = vpop.xlane.xlu1 %644 }
 0x264   : > { %1219 = vrcp.f32 %v645_v34 }
 0x26d   : > { %v1218_v35 = vpop.eup %1217 }
 0x26e   : > { %v648_v36 = vmul.f32 %v1218_v35, %v1214_v25 }
 0x270   : > { %1116 = vmatmul.mubr.msk.f32.vlgmr.msra.gmra.mxu0 %vm627_vm3, %v648_v36  ;;  %650 = vst.msk [vmem:[%s442_s10] sm:$0xff] %vm627_vm3, %v648_v36 }
 0x271   : > { %v1220_v37 = vpop.eup %1219 }
 0x272   : > { %v649_v38 = vmul.f32 %v1220_v37, %v1216_v27 }
 0x274   : > { %1123 = vmatmul.mubr.msk.f32.vlgmr.msra.gmra.mxu1 %vm627_vm3, %v649_v38  ;;  %651 = vst.msk [vmem:[%s442_s10 + $0x8] sm:$0xff] %vm627_vm3, %v649_v38 }
 0x275   : > { %1346 = shalt.err (!%p1343_p6)
}
 0x276   : > { %s1347_s14 = scalar_lea.hbm %s1718_s15, 256  ;;  %s1351_s12 = scalar_lea.hbm %s1813_s6, 512 }
 0x277   : > { %p1348_p7 = scmp.ne.s32.totalorder %s1718_s15, %s1347_s14  ;;  %p1352_p2 = scmp.lt.s32.totalorder %s1718_s15, %s1813_s6 }
 0x278   : > { %p1353_p8 = scmp.lt.s32.totalorder %s1351_s12, %s1347_s14 }
 0x279   : > { %p1349_p10 = pnand %p1348_p7, %p1558_p9 }
 0x27a   : > { %p1354_p0 = por %p1353_p8, %p1352_p2 }
 0x27b   : > { %p1350_p13 = pneg %p1349_p10 }
 0x27d   : > { %p1355_p1 = pnand %p1354_p0, %p1350_p13 }
 0x27f   : > { %1358 = shalt.err (!%p1355_p1)
}
 0x280   : > { %s1462_s25 = smov 128   ;;  %s1463_s22 = smov 8  }
 0x281   : > { %1134 = dma.vmem_to_hbm [thread:$0]  (%p1558_p9), %s1720_s18, 256, %s1718_s15, %s806_s29, %s1462_s25, %s1462_s25, %s1463_s22  }
 0x282   : > { %s435_s28 = scalar_lea.vmem [#allocation11], %s1661_s7  ;;  %s1757_s13 = scalar_lea.hbm %s1812_s5, %s1083_s8 }
 0x283   : > { %s822_s10 = sshll.u32 %s435_s28, 4  ;;  %s801_s7 = scalar_lea.sflag [#allocation5], %s1649_s2  ;;  %s1750_s10 = int_to_ptr.vmem [resolvable:$true] %s822_s10 }
 0x284   : > { %s1359_s18 = scalar_lea.vmem %s1750_s10, 256  ;;  %s1464_s15 = smov [#allocation11]  }
 0x285   : > { %p1360_p3 = scmp.ne.s32.totalorder %s1750_s10, %s1359_s18  ;;  %s1363_s29 = sshll.u32 %s1464_s15, 4  ;;  %s1364_s29 = int_to_ptr.vmem [resolvable:$false] %s1363_s29 }
 0x286   : > { %s1365_s16 = scalar_lea.vmem %s1364_s29, 512  ;;  %p1366_p6 = scmp.lt.s32.totalorder %s1750_s10, %s1364_s29 }
 0x287   : > { %p1361_p4 = pnand %p1360_p3, %p1558_p9  ;;  %p1367_p7 = scmp.lt.s32.totalorder %s1365_s16, %s1359_s18 }
 0x289   : > { %p1362_p5 = pneg %p1361_p4  ;;  %p1368_p10 = por %p1367_p7, %p1366_p6 }
 0x28b   : > { %p1369_p13 = pnand %p1368_p10, %p1362_p5 }
 0x330   : > { %v721_v39 = vpop.f32.mrf.mxu0 }
 0x331   : > { %798 = vst.msk [vmem:[%s435_s28] sm:$0xff] %vm459_vm1, %v721_v39 }
 0x332   : > { %v1117_v40 = vpop.f32.mrf.mxu0 }
 0x334   : > { %v794_v41 = vpop.f32.mrf.mxu1 }
 0x335   : > { %799 = vst.msk [vmem:[%s435_s28 + $0x8] sm:$0xff] %vm459_vm1, %v794_v41 }
 0x336   : > { %v1124_v42 = vpop.f32.mrf.mxu1 }
 0x337   : > { %1372 = shalt.err (!%p1369_p13)
}
 0x338   : > { %s1373_s26 = scalar_lea.hbm %s1757_s13, 256  ;;  %s1377_s1 = scalar_lea.hbm %s1812_s5, 512 }
 0x339   : > { %p1374_p2 = scmp.ne.s32.totalorder %s1757_s13, %s1373_s26  ;;  %p1378_p1 = scmp.lt.s32.totalorder %s1757_s13, %s1812_s5 }
 0x33a   : > { %p1379_p3 = scmp.lt.s32.totalorder %s1377_s1, %s1373_s26 }
 0x33b   : > { %p1375_p8 = pnand %p1374_p2, %p1558_p9 }
 0x33c   : > { %p1380_p4 = por %p1379_p3, %p1378_p1 }
 0x33d   : > { %p1376_p0 = pneg %p1375_p8 }
 0x33f   : > { %p1381_p5 = pnand %p1380_p4, %p1376_p0 }
 0x341   : > { %1384 = shalt.err (!%p1381_p5)
}
 0x342   : > { %1133 = dma.vmem_to_hbm [thread:$0]  (%p1558_p9), %s1750_s10, 256, %s1757_s13, %s801_s7, %s1462_s25, %s1462_s25, %s1463_s22  }
 0x343 PF: > { %s856_s30 = sand.u32 1, %s1431_s23   ;;  %p1151_p6 = pnand %p1045_p12, %p1565_p11 }
 0x344   : > { %s857_s12 = scalar_lea.sflag [#allocation5], %s856_s30 }
 0x345   : > { %p1152_p7 = pneg %p1151_p6 }
 0x347   : > { %1422 = dma.done.wait (%p1152_p7), %s857_s12, 256  }
 0x348   : > { %1424 = vsyncadd (%p1152_p7), %s857_s12, 4294967040  ;;  %s866_s19 = scalar_lea.sflag [#allocation13], %s856_s30 }
 0x349   : > { %1426 = dma.done.wait (%p1152_p7), %s866_s19, 256  }
 0x34a   : > { %1428 = vsyncadd (%p1152_p7), %s866_s19, 4294967040  ;;  %s33_s0 = sadd.s32 1, %s1451_s0   ;;  %s1840_s11 = sld [smem:[#allocation19_spill]] }
 0x34b   : > { %p30_p10 = scmp.ge.s32.totalorder %s33_s0, 4   ;;  %s1841_s25 = sld [smem:[#allocation21_spill]] }
 0x34c   : > { %s1842_s21 = sld [smem:[#allocation20_spill]]  ;;  %s1843_s23 = smov %s1435_s24 }
 0x34d   : > { %s1845_s26 = smov %s1447_s27 }
 0x34e   :  { %32 = sbr.rel (!%p30_p10) target bundleno = 17 (0x11), region = 139 }
 0x350   : > { %s1844_s24 = smov %s1840_s11 }
 0x352   : > { %s1846_s27 = smov %s1842_s21 }
 0x353   :  { %871 = vsyncpa [#allocation4], 1 }
 0x354   :  { %873 = vsyncpa [#allocation4 + $0x1], 1 }
 0x355   :  { %874 = vsyncpa [#allocation7], 1 }
 0x356   :  { %876 = vsyncpa [#allocation7 + $0x1], 1 }
 0x357   :  { %877 = vsyncpa [#allocation10], 1 }
 0x358   :  { %879 = vsyncpa [#allocation10 + $0x1], 1 }
 0x359   :  { %880 = vsyncpa [#allocation5], 1 }
 0x35a   :  { %882 = vsyncpa [#allocation5 + $0x1], 1 }
 0x35b   :  { %883 = vsyncpa [#allocation13], 1 }
 0x35c   :  { %885 = vsyncpa [#allocation13 + $0x1], 1 }

</bundles_post_ra>
